<compile_context>
chip_gen: v6e
topology: v6e:2x2x1
jax: 0.10.0
libtpu: 0.0.40
codegen_flags: <defaults>
</compile_context>

<pallas_src>
import functools

import jax
import jax.numpy as jnp
from jax import lax
from jax.experimental import pallas as pl
from jax.experimental.pallas import tpu as pltpu

START_TAG = '<START_TAG>'
END_TAG = '<END_TAG>'

# Tag vocabulary (deterministic, defined in-script).
TAGS = ['O', 'B-PER', 'I-PER', 'B-LOC', 'I-LOC', 'B-ORG', START_TAG, END_TAG]
TAG2IDX = {t: i for i, t in enumerate(TAGS)}
TAG_SIZE = len(TAGS)          # 8
START_IDX = TAG2IDX[START_TAG]
END_IDX = TAG2IDX[END_TAG]


def _crf_forward_kernel(trans_ref, feats_ref, mask_ref, out_ref,
                        *, start_idx, end_idx):
    """Whole CRF forward recursion in one kernel invocation.

    Layouts (batch on lanes, tags on sublanes):
      trans_ref : (T, T) f32   trans[i, j] = score of transition j -> i
      feats_ref : (S, T, B) f32
      mask_ref  : (S, B) f32
      out_ref   : (1, B) f32
    """
    S, T, B = feats_ref.shape

    trans = trans_ref[...]                                         # (T, T)
    # Hoisted out of the serial loop: one EUP pass.  exp(-10000) underflows to
    # exactly 0 for forbidden transitions (-> START and END ->), which is the
    # correct contribution.
    exp_trans = jnp.exp(trans)                                      # (T, T)

    # alpha[i, b]: -10000 everywhere, 0 on the START row.
    row = lax.broadcasted_iota(jnp.int32, (T, B), 0)
    alpha = jnp.where(row == start_idx,
                      jnp.float32(0.0), jnp.float32(-10000.0))      # (T, B)

    tiny = jnp.float32(1e-30)

    # Fully-unrolled recurrence (S small & static): static slices, maximum
    # scheduler visibility; the contraction over previous tags runs on the MXU.
    for t in range(S):
        feat = feats_ref[t]                                         # (T, B)
        mask_t = mask_ref[pl.ds(t, 1), :]                           # (1, B)

        m = jnp.max(alpha, axis=0, keepdims=True)                   # (1, B)
        ea = jnp.exp(alpha - m)                                      # (T, B)
        s = jnp.dot(exp_trans, ea,
                    preferred_element_type=jnp.float32,
                    precision=lax.Precision.HIGHEST)                # (T, B) MXU
        lse = feat + m + jnp.log(jnp.maximum(s, tiny))              # (T, B)

        # keep previous alpha where this timestep is padding
        alpha = jnp.where(mask_t != 0.0, lse, alpha)

    # Finalize: logsumexp_i(alpha[i, b] + trans[end, i]) via the same matmul
    # shape, then statically slice the END row (no lane<->sublane relayout).
    m2 = jnp.max(alpha, axis=0, keepdims=True)                      # (1, B)
    ea2 = jnp.exp(alpha - m2)                                        # (T, B)
    z = jnp.dot(exp_trans, ea2,
                preferred_element_type=jnp.float32,
                precision=lax.Precision.HIGHEST)                    # (T, B)
    z_end = z[end_idx:end_idx + 1, :]                               # (1, B)
    out_ref[...] = m2 + jnp.log(jnp.maximum(z_end, tiny))           # (1, B)


def crf_forward(feats, mask, transition):
    """feats: (S, B, T) f32, mask: (S, B) f32, transition: (T, T) f32 -> (B,) f32."""
    S, B, T = feats.shape
    # Layout change done in the wrapper (not in-kernel): batch -> lane axis.
    feats_tb = jnp.transpose(feats, (0, 2, 1))                      # (S, T, B)

    kernel = functools.partial(_crf_forward_kernel,
                               start_idx=START_IDX, end_idx=END_IDX)
    out = pl.pallas_call(
        kernel,
        out_shape=jax.ShapeDtypeStruct((1, B), jnp.float32),
        grid_spec=pltpu.PrefetchScalarGridSpec(
            num_scalar_prefetch=0,
            grid=(1,),                                    # single invocation
            in_specs=[
                pl.BlockSpec((T, T), lambda i: (0, 0)),         # transition
                pl.BlockSpec((S, T, B), lambda i: (0, 0, 0)),   # whole feats
                pl.BlockSpec((S, B), lambda i: (0, 0)),         # whole mask
            ],
            out_specs=pl.BlockSpec((1, B), lambda i: (0, 0)),
        ),
        compiler_params=pltpu.CompilerParams(
            dimension_semantics=("arbitrary",)),
    )(transition, feats_tb, mask)
    return out[0]


def make_transition(key, tag_size):
    """Deterministic xavier_normal-style init + START/END constraints."""
    std = (2.0 / (tag_size + tag_size)) ** 0.5
    trans = jax.random.normal(key, (tag_size, tag_size), dtype=jnp.float32) * std
    trans = trans.at[START_IDX, :].set(-10000.0)   # nothing transitions TO start
    trans = trans.at[:, END_IDX].set(-10000.0)     # nothing transitions FROM end
    return trans


def crf_forward_ref(feats, mask, transition):
    """Pure-JAX port of the PyTorch forward, for a correctness check."""
    S, B, T = feats.shape
    alpha = jnp.full((B, T), -10000.0, dtype=jnp.float32).at[:, START_IDX].set(0.0)
    for t in range(S):
        score = alpha[:, None, :] + transition[None, :, :] + feats[t][:, :, None]
        lse = jax.scipy.special.logsumexp(score, axis=-1)
        m = mask[t][:, None]
        alpha = lse * m + alpha * (m == 0.0).astype(jnp.float32)
    alpha = alpha + transition[END_IDX][None, :]
    return jax.scipy.special.logsumexp(alpha, axis=-1)


if __name__ == "__main__":
    key = jax.random.PRNGKey(0)
    k_t, k_f = jax.random.split(key)

    seq_len, batch_size = 8, 4
    transition = make_transition(k_t, TAG_SIZE)
    feats = jax.random.normal(k_f, (seq_len, batch_size, TAG_SIZE), dtype=jnp.float32)

    # binary float mask with varying sequence lengths (padding at the tail)
    lengths = jnp.array([8, 6, 5, 3], dtype=jnp.int32)
    mask = (jnp.arange(seq_len)[:, None] < lengths[None, :]).astype(jnp.float32)

    out = crf_forward(feats, mask, transition)
    out = jax.block_until_ready(out)

    ref = crf_forward_ref(feats, mask, transition)
    assert jnp.allclose(out, ref, rtol=1e-4, atol=1e-4), (out, ref)

    print("KERNEL_OK")
</pallas_src>

<mosaic_0001>
module attributes {stable_mosaic.version = 11 : i64} {
  func.func @_crf_forward_kernel(%arg0: i32, %arg1: memref<8x8xf32, #tpu.memory_space<vmem>>, %arg2: memref<8x8x4xf32, #tpu.memory_space<vmem>>, %arg3: memref<8x4xf32, #tpu.memory_space<vmem>>, %arg4: memref<1x4xf32, #tpu.memory_space<vmem>>) attributes {dimension_semantics = [#tpu.dimension_semantics<arbitrary>], iteration_bounds = array<i64: 1>, scalar_prefetch = 0 : i64, scratch_operands = 0 : i64, tpu.core_type = #tpu.core_type<tc>, window_params = [{pipeline_mode = #tpu.pipeline_mode<synchronous>, transform_indices = @transform_0, window_bounds = array<i64: 8, 8>}, {pipeline_mode = #tpu.pipeline_mode<synchronous>, transform_indices = @transform_1, window_bounds = array<i64: 8, 8, 4>}, {pipeline_mode = #tpu.pipeline_mode<synchronous>, transform_indices = @transform_2, window_bounds = array<i64: 8, 4>}, {pipeline_mode = #tpu.pipeline_mode<synchronous>, transform_indices = @transform_3, window_bounds = array<i64: 1, 4>}]} {
    %c0 = arith.constant 0 : index
    %c0_0 = arith.constant 0 : index
    %0 = vector.load %arg1[%c0, %c0_0] : memref<8x8xf32, #tpu.memory_space<vmem>>, vector<8x8xf32>
    %1 = math.exp %0 : vector<8x8xf32>
    %2 = tpu.iota {dimensions = array<i32: 0>} : vector<8x4xi32>
    %c6_i32 = arith.constant 6 : i32
    %3 = vector.broadcast %c6_i32 : i32 to vector<8x4xi32>
    %4 = arith.cmpi eq, %2, %3 : vector<8x4xi32>
    %cst = arith.constant 0.000000e+00 : f32
    %cst_1 = arith.constant -1.000000e+04 : f32
    %5 = vector.broadcast %cst : f32 to vector<8x4xf32>
    %6 = vector.broadcast %cst_1 : f32 to vector<8x4xf32>
    %7 = arith.select %4, %5, %6 : vector<8x4xi1>, vector<8x4xf32>
    %c0_2 = arith.constant 0 : index
    %c0_3 = arith.constant 0 : index
    %c0_4 = arith.constant 0 : index
    %8 = vector.load %arg2[%c0_2, %c0_3, %c0_4] : memref<8x8x4xf32, #tpu.memory_space<vmem>>, vector<1x8x4xf32>
    %9 = vector.shape_cast %8 : vector<1x8x4xf32> to vector<8x4xf32>
    %c0_5 = arith.constant 0 : index
    %c0_6 = arith.constant 0 : index
    %10 = vector.load %arg3[%c0_5, %c0_6] : memref<8x4xf32, #tpu.memory_space<vmem>>, vector<1x4xf32>
    %cst_7 = arith.constant dense<0xFF800000> : vector<4xf32>
    %11 = vector.multi_reduction <maximumf>, %7, %cst_7 [0] : vector<8x4xf32> to vector<4xf32>
    %12 = vector.shape_cast %11 : vector<4xf32> to vector<1x4xf32>
    %13 = vector.broadcast %12 : vector<1x4xf32> to vector<8x4xf32>
    %14 = arith.subf %7, %13 : vector<8x4xf32>
    %15 = math.exp %14 : vector<8x4xf32>
    %cst_8 = arith.constant dense<0.000000e+00> : vector<8x4xf32>
    %16 = tpu.matmul %1, %15, %cst_8 {dimension_numbers = #tpu.dot_dimension_numbers<[1], [0], [0], [1], [0, 0, 1, 1], [], []>, precision = #tpu.contract_precision<fp32>} : vector<8x8xf32>, vector<8x4xf32>, vector<8x4xf32> -> vector<8x4xf32>
    %17 = vector.broadcast %12 : vector<1x4xf32> to vector<8x4xf32>
    %18 = arith.addf %9, %17 : vector<8x4xf32>
    %cst_9 = arith.constant 1.000000e-30 : f32
    %19 = vector.broadcast %cst_9 : f32 to vector<8x4xf32>
    %20 = arith.maximumf %16, %19 : vector<8x4xf32>
    %21 = math.log %20 : vector<8x4xf32>
    %22 = arith.addf %18, %21 : vector<8x4xf32>
    %cst_10 = arith.constant 0.000000e+00 : f32
    %23 = vector.broadcast %cst_10 : f32 to vector<1x4xf32>
    %24 = arith.cmpf one, %10, %23 : vector<1x4xf32>
    %25 = vector.shape_cast %24 : vector<1x4xi1> to vector<1x4xi1>
    %26 = vector.broadcast %25 : vector<1x4xi1> to vector<8x4xi1>
    %27 = arith.select %26, %22, %7 : vector<8x4xi1>, vector<8x4xf32>
    %c1 = arith.constant 1 : index
    %c0_11 = arith.constant 0 : index
    %c0_12 = arith.constant 0 : index
    %28 = vector.load %arg2[%c1, %c0_11, %c0_12] : memref<8x8x4xf32, #tpu.memory_space<vmem>>, vector<1x8x4xf32>
    %29 = vector.shape_cast %28 : vector<1x8x4xf32> to vector<8x4xf32>
    %c1_13 = arith.constant 1 : index
    %c0_14 = arith.constant 0 : index
    %30 = vector.load %arg3[%c1_13, %c0_14] : memref<8x4xf32, #tpu.memory_space<vmem>>, vector<1x4xf32>
    %cst_15 = arith.constant dense<0xFF800000> : vector<4xf32>
    %31 = vector.multi_reduction <maximumf>, %27, %cst_15 [0] : vector<8x4xf32> to vector<4xf32>
    %32 = vector.shape_cast %31 : vector<4xf32> to vector<1x4xf32>
    %33 = vector.broadcast %32 : vector<1x4xf32> to vector<8x4xf32>
    %34 = arith.subf %27, %33 : vector<8x4xf32>
    %35 = math.exp %34 : vector<8x4xf32>
    %cst_16 = arith.constant dense<0.000000e+00> : vector<8x4xf32>
    %36 = tpu.matmul %1, %35, %cst_16 {dimension_numbers = #tpu.dot_dimension_numbers<[1], [0], [0], [1], [0, 0, 1, 1], [], []>, precision = #tpu.contract_precision<fp32>} : vector<8x8xf32>, vector<8x4xf32>, vector<8x4xf32> -> vector<8x4xf32>
    %37 = vector.broadcast %32 : vector<1x4xf32> to vector<8x4xf32>
    %38 = arith.addf %29, %37 : vector<8x4xf32>
    %cst_17 = arith.constant 1.000000e-30 : f32
    %39 = vector.broadcast %cst_17 : f32 to vector<8x4xf32>
    %40 = arith.maximumf %36, %39 : vector<8x4xf32>
    %41 = math.log %40 : vector<8x4xf32>
    %42 = arith.addf %38, %41 : vector<8x4xf32>
    %cst_18 = arith.constant 0.000000e+00 : f32
    %43 = vector.broadcast %cst_18 : f32 to vector<1x4xf32>
    %44 = arith.cmpf one, %30, %43 : vector<1x4xf32>
    %45 = vector.shape_cast %44 : vector<1x4xi1> to vector<1x4xi1>
    %46 = vector.broadcast %45 : vector<1x4xi1> to vector<8x4xi1>
    %47 = arith.select %46, %42, %27 : vector<8x4xi1>, vector<8x4xf32>
    %c2 = arith.constant 2 : index
    %c0_19 = arith.constant 0 : index
    %c0_20 = arith.constant 0 : index
    %48 = vector.load %arg2[%c2, %c0_19, %c0_20] : memref<8x8x4xf32, #tpu.memory_space<vmem>>, vector<1x8x4xf32>
    %49 = vector.shape_cast %48 : vector<1x8x4xf32> to vector<8x4xf32>
    %c2_21 = arith.constant 2 : index
    %c0_22 = arith.constant 0 : index
    %50 = vector.load %arg3[%c2_21, %c0_22] : memref<8x4xf32, #tpu.memory_space<vmem>>, vector<1x4xf32>
    %cst_23 = arith.constant dense<0xFF800000> : vector<4xf32>
    %51 = vector.multi_reduction <maximumf>, %47, %cst_23 [0] : vector<8x4xf32> to vector<4xf32>
    %52 = vector.shape_cast %51 : vector<4xf32> to vector<1x4xf32>
    %53 = vector.broadcast %52 : vector<1x4xf32> to vector<8x4xf32>
    %54 = arith.subf %47, %53 : vector<8x4xf32>
    %55 = math.exp %54 : vector<8x4xf32>
    %cst_24 = arith.constant dense<0.000000e+00> : vector<8x4xf32>
    %56 = tpu.matmul %1, %55, %cst_24 {dimension_numbers = #tpu.dot_dimension_numbers<[1], [0], [0], [1], [0, 0, 1, 1], [], []>, precision = #tpu.contract_precision<fp32>} : vector<8x8xf32>, vector<8x4xf32>, vector<8x4xf32> -> vector<8x4xf32>
    %57 = vector.broadcast %52 : vector<1x4xf32> to vector<8x4xf32>
    %58 = arith.addf %49, %57 : vector<8x4xf32>
    %cst_25 = arith.constant 1.000000e-30 : f32
    %59 = vector.broadcast %cst_25 : f32 to vector<8x4xf32>
    %60 = arith.maximumf %56, %59 : vector<8x4xf32>
    %61 = math.log %60 : vector<8x4xf32>
    %62 = arith.addf %58, %61 : vector<8x4xf32>
    %cst_26 = arith.constant 0.000000e+00 : f32
    %63 = vector.broadcast %cst_26 : f32 to vector<1x4xf32>
    %64 = arith.cmpf one, %50, %63 : vector<1x4xf32>
    %65 = vector.shape_cast %64 : vector<1x4xi1> to vector<1x4xi1>
    %66 = vector.broadcast %65 : vector<1x4xi1> to vector<8x4xi1>
    %67 = arith.select %66, %62, %47 : vector<8x4xi1>, vector<8x4xf32>
    %c3 = arith.constant 3 : index
    %c0_27 = arith.constant 0 : index
    %c0_28 = arith.constant 0 : index
    %68 = vector.load %arg2[%c3, %c0_27, %c0_28] : memref<8x8x4xf32, #tpu.memory_space<vmem>>, vector<1x8x4xf32>
    %69 = vector.shape_cast %68 : vector<1x8x4xf32> to vector<8x4xf32>
    %c3_29 = arith.constant 3 : index
    %c0_30 = arith.constant 0 : index
    %70 = vector.load %arg3[%c3_29, %c0_30] : memref<8x4xf32, #tpu.memory_space<vmem>>, vector<1x4xf32>
    %cst_31 = arith.constant dense<0xFF800000> : vector<4xf32>
    %71 = vector.multi_reduction <maximumf>, %67, %cst_31 [0] : vector<8x4xf32> to vector<4xf32>
    %72 = vector.shape_cast %71 : vector<4xf32> to vector<1x4xf32>
    %73 = vector.broadcast %72 : vector<1x4xf32> to vector<8x4xf32>
    %74 = arith.subf %67, %73 : vector<8x4xf32>
    %75 = math.exp %74 : vector<8x4xf32>
    %cst_32 = arith.constant dense<0.000000e+00> : vector<8x4xf32>
    %76 = tpu.matmul %1, %75, %cst_32 {dimension_numbers = #tpu.dot_dimension_numbers<[1], [0], [0], [1], [0, 0, 1, 1], [], []>, precision = #tpu.contract_precision<fp32>} : vector<8x8xf32>, vector<8x4xf32>, vector<8x4xf32> -> vector<8x4xf32>
    %77 = vector.broadcast %72 : vector<1x4xf32> to vector<8x4xf32>
    %78 = arith.addf %69, %77 : vector<8x4xf32>
    %cst_33 = arith.constant 1.000000e-30 : f32
    %79 = vector.broadcast %cst_33 : f32 to vector<8x4xf32>
    %80 = arith.maximumf %76, %79 : vector<8x4xf32>
    %81 = math.log %80 : vector<8x4xf32>
    %82 = arith.addf %78, %81 : vector<8x4xf32>
    %cst_34 = arith.constant 0.000000e+00 : f32
    %83 = vector.broadcast %cst_34 : f32 to vector<1x4xf32>
    %84 = arith.cmpf one, %70, %83 : vector<1x4xf32>
    %85 = vector.shape_cast %84 : vector<1x4xi1> to vector<1x4xi1>
    %86 = vector.broadcast %85 : vector<1x4xi1> to vector<8x4xi1>
    %87 = arith.select %86, %82, %67 : vector<8x4xi1>, vector<8x4xf32>
    %c4 = arith.constant 4 : index
    %c0_35 = arith.constant 0 : index
    %c0_36 = arith.constant 0 : index
    %88 = vector.load %arg2[%c4, %c0_35, %c0_36] : memref<8x8x4xf32, #tpu.memory_space<vmem>>, vector<1x8x4xf32>
    %89 = vector.shape_cast %88 : vector<1x8x4xf32> to vector<8x4xf32>
    %c4_37 = arith.constant 4 : index
    %c0_38 = arith.constant 0 : index
    %90 = vector.load %arg3[%c4_37, %c0_38] : memref<8x4xf32, #tpu.memory_space<vmem>>, vector<1x4xf32>
    %cst_39 = arith.constant dense<0xFF800000> : vector<4xf32>
    %91 = vector.multi_reduction <maximumf>, %87, %cst_39 [0] : vector<8x4xf32> to vector<4xf32>
    %92 = vector.shape_cast %91 : vector<4xf32> to vector<1x4xf32>
    %93 = vector.broadcast %92 : vector<1x4xf32> to vector<8x4xf32>
    %94 = arith.subf %87, %93 : vector<8x4xf32>
    %95 = math.exp %94 : vector<8x4xf32>
    %cst_40 = arith.constant dense<0.000000e+00> : vector<8x4xf32>
    %96 = tpu.matmul %1, %95, %cst_40 {dimension_numbers = #tpu.dot_dimension_numbers<[1], [0], [0], [1], [0, 0, 1, 1], [], []>, precision = #tpu.contract_precision<fp32>} : vector<8x8xf32>, vector<8x4xf32>, vector<8x4xf32> -> vector<8x4xf32>
    %97 = vector.broadcast %92 : vector<1x4xf32> to vector<8x4xf32>
    %98 = arith.addf %89, %97 : vector<8x4xf32>
    %cst_41 = arith.constant 1.000000e-30 : f32
    %99 = vector.broadcast %cst_41 : f32 to vector<8x4xf32>
    %100 = arith.maximumf %96, %99 : vector<8x4xf32>
    %101 = math.log %100 : vector<8x4xf32>
    %102 = arith.addf %98, %101 : vector<8x4xf32>
    %cst_42 = arith.constant 0.000000e+00 : f32
    %103 = vector.broadcast %cst_42 : f32 to vector<1x4xf32>
    %104 = arith.cmpf one, %90, %103 : vector<1x4xf32>
    %105 = vector.shape_cast %104 : vector<1x4xi1> to vector<1x4xi1>
    %106 = vector.broadcast %105 : vector<1x4xi1> to vector<8x4xi1>
    %107 = arith.select %106, %102, %87 : vector<8x4xi1>, vector<8x4xf32>
    %c5 = arith.constant 5 : index
    %c0_43 = arith.constant 0 : index
    %c0_44 = arith.constant 0 : index
    %108 = vector.load %arg2[%c5, %c0_43, %c0_44] : memref<8x8x4xf32, #tpu.memory_space<vmem>>, vector<1x8x4xf32>
    %109 = vector.shape_cast %108 : vector<1x8x4xf32> to vector<8x4xf32>
    %c5_45 = arith.constant 5 : index
    %c0_46 = arith.constant 0 : index
    %110 = vector.load %arg3[%c5_45, %c0_46] : memref<8x4xf32, #tpu.memory_space<vmem>>, vector<1x4xf32>
    %cst_47 = arith.constant dense<0xFF800000> : vector<4xf32>
    %111 = vector.multi_reduction <maximumf>, %107, %cst_47 [0] : vector<8x4xf32> to vector<4xf32>
    %112 = vector.shape_cast %111 : vector<4xf32> to vector<1x4xf32>
    %113 = vector.broadcast %112 : vector<1x4xf32> to vector<8x4xf32>
    %114 = arith.subf %107, %113 : vector<8x4xf32>
    %115 = math.exp %114 : vector<8x4xf32>
    %cst_48 = arith.constant dense<0.000000e+00> : vector<8x4xf32>
    %116 = tpu.matmul %1, %115, %cst_48 {dimension_numbers = #tpu.dot_dimension_numbers<[1], [0], [0], [1], [0, 0, 1, 1], [], []>, precision = #tpu.contract_precision<fp32>} : vector<8x8xf32>, vector<8x4xf32>, vector<8x4xf32> -> vector<8x4xf32>
    %117 = vector.broadcast %112 : vector<1x4xf32> to vector<8x4xf32>
    %118 = arith.addf %109, %117 : vector<8x4xf32>
    %cst_49 = arith.constant 1.000000e-30 : f32
    %119 = vector.broadcast %cst_49 : f32 to vector<8x4xf32>
    %120 = arith.maximumf %116, %119 : vector<8x4xf32>
    %121 = math.log %120 : vector<8x4xf32>
    %122 = arith.addf %118, %121 : vector<8x4xf32>
    %cst_50 = arith.constant 0.000000e+00 : f32
    %123 = vector.broadcast %cst_50 : f32 to vector<1x4xf32>
    %124 = arith.cmpf one, %110, %123 : vector<1x4xf32>
    %125 = vector.shape_cast %124 : vector<1x4xi1> to vector<1x4xi1>
    %126 = vector.broadcast %125 : vector<1x4xi1> to vector<8x4xi1>
    %127 = arith.select %126, %122, %107 : vector<8x4xi1>, vector<8x4xf32>
    %c6 = arith.constant 6 : index
    %c0_51 = arith.constant 0 : index
    %c0_52 = arith.constant 0 : index
    %128 = vector.load %arg2[%c6, %c0_51, %c0_52] : memref<8x8x4xf32, #tpu.memory_space<vmem>>, vector<1x8x4xf32>
    %129 = vector.shape_cast %128 : vector<1x8x4xf32> to vector<8x4xf32>
    %c6_53 = arith.constant 6 : index
    %c0_54 = arith.constant 0 : index
    %130 = vector.load %arg3[%c6_53, %c0_54] : memref<8x4xf32, #tpu.memory_space<vmem>>, vector<1x4xf32>
    %cst_55 = arith.constant dense<0xFF800000> : vector<4xf32>
    %131 = vector.multi_reduction <maximumf>, %127, %cst_55 [0] : vector<8x4xf32> to vector<4xf32>
    %132 = vector.shape_cast %131 : vector<4xf32> to vector<1x4xf32>
    %133 = vector.broadcast %132 : vector<1x4xf32> to vector<8x4xf32>
    %134 = arith.subf %127, %133 : vector<8x4xf32>
    %135 = math.exp %134 : vector<8x4xf32>
    %cst_56 = arith.constant dense<0.000000e+00> : vector<8x4xf32>
    %136 = tpu.matmul %1, %135, %cst_56 {dimension_numbers = #tpu.dot_dimension_numbers<[1], [0], [0], [1], [0, 0, 1, 1], [], []>, precision = #tpu.contract_precision<fp32>} : vector<8x8xf32>, vector<8x4xf32>, vector<8x4xf32> -> vector<8x4xf32>
    %137 = vector.broadcast %132 : vector<1x4xf32> to vector<8x4xf32>
    %138 = arith.addf %129, %137 : vector<8x4xf32>
    %cst_57 = arith.constant 1.000000e-30 : f32
    %139 = vector.broadcast %cst_57 : f32 to vector<8x4xf32>
    %140 = arith.maximumf %136, %139 : vector<8x4xf32>
    %141 = math.log %140 : vector<8x4xf32>
    %142 = arith.addf %138, %141 : vector<8x4xf32>
    %cst_58 = arith.constant 0.000000e+00 : f32
    %143 = vector.broadcast %cst_58 : f32 to vector<1x4xf32>
    %144 = arith.cmpf one, %130, %143 : vector<1x4xf32>
    %145 = vector.shape_cast %144 : vector<1x4xi1> to vector<1x4xi1>
    %146 = vector.broadcast %145 : vector<1x4xi1> to vector<8x4xi1>
    %147 = arith.select %146, %142, %127 : vector<8x4xi1>, vector<8x4xf32>
    %c7 = arith.constant 7 : index
    %c0_59 = arith.constant 0 : index
    %c0_60 = arith.constant 0 : index
    %148 = vector.load %arg2[%c7, %c0_59, %c0_60] : memref<8x8x4xf32, #tpu.memory_space<vmem>>, vector<1x8x4xf32>
    %149 = vector.shape_cast %148 : vector<1x8x4xf32> to vector<8x4xf32>
    %c7_61 = arith.constant 7 : index
    %c0_62 = arith.constant 0 : index
    %150 = vector.load %arg3[%c7_61, %c0_62] : memref<8x4xf32, #tpu.memory_space<vmem>>, vector<1x4xf32>
    %cst_63 = arith.constant dense<0xFF800000> : vector<4xf32>
    %151 = vector.multi_reduction <maximumf>, %147, %cst_63 [0] : vector<8x4xf32> to vector<4xf32>
    %152 = vector.shape_cast %151 : vector<4xf32> to vector<1x4xf32>
    %153 = vector.broadcast %152 : vector<1x4xf32> to vector<8x4xf32>
    %154 = arith.subf %147, %153 : vector<8x4xf32>
    %155 = math.exp %154 : vector<8x4xf32>
    %cst_64 = arith.constant dense<0.000000e+00> : vector<8x4xf32>
    %156 = tpu.matmul %1, %155, %cst_64 {dimension_numbers = #tpu.dot_dimension_numbers<[1], [0], [0], [1], [0, 0, 1, 1], [], []>, precision = #tpu.contract_precision<fp32>} : vector<8x8xf32>, vector<8x4xf32>, vector<8x4xf32> -> vector<8x4xf32>
    %157 = vector.broadcast %152 : vector<1x4xf32> to vector<8x4xf32>
    %158 = arith.addf %149, %157 : vector<8x4xf32>
    %cst_65 = arith.constant 1.000000e-30 : f32
    %159 = vector.broadcast %cst_65 : f32 to vector<8x4xf32>
    %160 = arith.maximumf %156, %159 : vector<8x4xf32>
    %161 = math.log %160 : vector<8x4xf32>
    %162 = arith.addf %158, %161 : vector<8x4xf32>
    %cst_66 = arith.constant 0.000000e+00 : f32
    %163 = vector.broadcast %cst_66 : f32 to vector<1x4xf32>
    %164 = arith.cmpf one, %150, %163 : vector<1x4xf32>
    %165 = vector.shape_cast %164 : vector<1x4xi1> to vector<1x4xi1>
    %166 = vector.broadcast %165 : vector<1x4xi1> to vector<8x4xi1>
    %167 = arith.select %166, %162, %147 : vector<8x4xi1>, vector<8x4xf32>
    %cst_67 = arith.constant dense<0xFF800000> : vector<4xf32>
    %168 = vector.multi_reduction <maximumf>, %167, %cst_67 [0] : vector<8x4xf32> to vector<4xf32>
    %169 = vector.shape_cast %168 : vector<4xf32> to vector<1x4xf32>
    %170 = vector.broadcast %169 : vector<1x4xf32> to vector<8x4xf32>
    %171 = arith.subf %167, %170 : vector<8x4xf32>
    %172 = math.exp %171 : vector<8x4xf32>
    %cst_68 = arith.constant dense<0.000000e+00> : vector<8x4xf32>
    %173 = tpu.matmul %1, %172, %cst_68 {dimension_numbers = #tpu.dot_dimension_numbers<[1], [0], [0], [1], [0, 0, 1, 1], [], []>, precision = #tpu.contract_precision<fp32>} : vector<8x8xf32>, vector<8x4xf32>, vector<8x4xf32> -> vector<8x4xf32>
    %174 = vector.extract_strided_slice %173 {offsets = [7, 0], sizes = [1, 4], strides = [1, 1]} : vector<8x4xf32> to vector<1x4xf32>
    %cst_69 = arith.constant 1.000000e-30 : f32
    %175 = vector.broadcast %cst_69 : f32 to vector<1x4xf32>
    %176 = arith.maximumf %174, %175 : vector<1x4xf32>
    %177 = math.log %176 : vector<1x4xf32>
    %178 = arith.addf %169, %177 : vector<1x4xf32>
    %c0_70 = arith.constant 0 : index
    %c0_71 = arith.constant 0 : index
    %179 = vector.load %arg4[%c0_70, %c0_71] : memref<1x4xf32, #tpu.memory_space<vmem>>, vector<1x4xf32>
    tpu.vector_store %arg4[%c0_70, %c0_71], %178 {strides = array<i32>} : memref<1x4xf32, #tpu.memory_space<vmem>>, vector<1x4xf32>,
    return
  }
  func.func @transform_0(%arg0: i32) -> (i32, i32) {
    %c0_i32 = arith.constant 0 : i32
    %c0_i32_0 = arith.constant 0 : i32
    %c0_i32_1 = arith.constant 0 : i32
    return %c0_i32, %c0_i32_0 : i32, i32
  }
  func.func @transform_1(%arg0: i32) -> (i32, i32, i32) {
    %c0_i32 = arith.constant 0 : i32
    %c0_i32_0 = arith.constant 0 : i32
    %c0_i32_1 = arith.constant 0 : i32
    %c0_i32_2 = arith.constant 0 : i32
    return %c0_i32, %c0_i32_0, %c0_i32_1 : i32, i32, i32
  }
  func.func @transform_2(%arg0: i32) -> (i32, i32) {
    %c0_i32 = arith.constant 0 : i32
    %c0_i32_0 = arith.constant 0 : i32
    %c0_i32_1 = arith.constant 0 : i32
    return %c0_i32, %c0_i32_0 : i32, i32
  }
  func.func @transform_3(%arg0: i32) -> (i32, i32) {
    %c0_i32 = arith.constant 0 : i32
    %c0_i32_0 = arith.constant 0 : i32
    %c0_i32_1 = arith.constant 0 : i32
    return %c0_i32, %c0_i32_0 : i32, i32
  }
}

</mosaic_0001>

<bundles_post_ra>
// kernel: tpu_custom_call.1
= control target key start
LH: loop header
LB: loop body
LE: loop exit
PB: predicated region body
PF: predicated region fallthrough
CT: control target
= control target key end

     0   :  { %v18_v0 = vlaneseq  ;;  %s5109_s0 = inlined_call_operand.vmem [shape: f32[8,8], index: 0, kind: input, shape index: {}]   ;;  %s5110_s1 = inlined_call_operand.vmem [shape: f32[8,8,4], index: 1, kind: input, shape index: {}]   ;;  %s5111_s2 = inlined_call_operand.vmem [shape: f32[8,4], index: 2, kind: input, shape index: {}]   ;;  %s5112_s3 = inlined_call_operand.hbm [shape: f32[1,4], index: 3, kind: output, shape index: {}]  }
   0x1   :  { %v15_v1 = vld [vmem:[%s5109_s0] sm:$0xff] }
   0x2   :  { %8 = vsyncpa [#allocation3], 0  ;;  %v4727_v2 = vmov 0.0   ;;  %vm4728_vm0 = vmmov 0   ;;  %v16_v3 = vmul.f32 1.442695, %v15_v1 }
   0x3   :  { %4392 = vmatprep.subr.mxu0 %v4727_v2  ;;  %4394 = vmatprep.mubr.msk.f32.mxu0 %vm4728_vm0, %v4727_v2  ;;  %v4758_v4 = vshrl.u32 %v18_v0, 7  ;;  %v4729_v5 = vmov -10000.0   ;;  %vm33_vm2 = vcmask 64512   ;;  %v23_v46 = vld [vmem:[%s5111_s2] sm:$0x1]  ;;  %v4730_v48 = vmov 0  }
   0x4   :  { %4397 = vmatprep.subr.mxu1 %v4727_v2  ;;  %4399 = vmatprep.mubr.msk.f32.mxu1 %vm4728_vm0, %v4727_v2  ;;  %4667 = vpow2.f32 %v16_v3  ;;  %vm488_vm3 = vcmp.ne.f32.partialorder %v23_v46, 0.0  ;;  %v22_v50 = vld [vmem:[%s5110_s1] sm:$0xff]  ;;  %vm499_vm5 = vcmask 31744  }
   0x5   :  { %vm20_vm1 = vcmp.eq.s32.totalorder %v4758_v4, 6  ;;  %v4812_v47 = vsub.s32 0, %v4758_v4  ;;  %v489_v49 = vsel %vm488_vm3, 1, %v4730_v48 }
   0x6   :  { %v4764_v6 = vsel %vm20_vm1, 0.0, %v4729_v5 }
   0x7   :  { %v24_v7 = vrot.slane %v4764_v6, 4  ;;  %v493_v51 = vrot.slane %v489_v49, %v4812_v47 }
   0x9   :  { %v25_v8 = vmax.f32 %v4764_v6, %v24_v7  ;;  %vm494_vm4 = vcmp.eq.s32.totalorder %v493_v51, 1 }
   0xb   :  { %v26_v9 = vrot.slane %v25_v8, 2 }
   0xd   :  { %v27_v10 = vmax.f32 %v25_v8, %v26_v9 }
   0xf   :  { %v28_v11 = vrot.slane %v27_v10, 1 }
  0x11   :  { %v4668_v12 = vpop.eup %4667  ;;  %v4768_v13 = vmax.f32 %v27_v10, %v28_v11 }
  0x12   :  { %v35_v14 = vsel %vm33_vm2, %v4668_v12, 0 }
  0x13   :  { %v30_v15 = vsub.f32 %v4764_v6, %v4768_v13  ;;  %v4772_v16 = vand.u32 4294901760, %v35_v14  ;;  %v483_v52 = vadd.f32 %v4768_v13, %v22_v50 }
  0x15   :  { %v31_v17 = vmul.f32 1.442695, %v30_v15  ;;  %v4775_v18 = vsub.f32 %v35_v14, %v4772_v16 }
  0x17   :  { %4669 = vpow2.f32 %v31_v17  ;;  %v4778_v19 = vand.u32 4294901760, %v4775_v18 }
  0x19   :  { %v106_v20 = vsub.f32 %v4775_v18, %v4778_v19 }
  0x1b   :  { %v4782_v22 = vand.u32 4294901760, %v106_v20 }
  0x24   :  { %v4670_v21 = vpop.eup %4669 }
  0x25   :  { %v68_v23 = vand.u32 4294901760, %v4670_v21 }
  0x27   :  { %4393 = vmatpush3.msra.mxu0 %v68_v23  ;;  %v145_v24 = vsub.f32 %v4670_v21, %v68_v23 }
  0x28   :  { %4395 = vmatmul.mubr.f32.vlgmr.msra.gmra.mxu0 %v4782_v22  ;;  %4402 = vmatprep.subr.mxu0 %v4727_v2 }
  0x29   :  { %v146_v25 = vand.u32 4294901760, %v145_v24  ;;  %4403 = vmatpush3.msra.mxu0 %v145_v24  ;;  %4404 = vmatprep.mubr.msk.f32.mxu0 %vm4728_vm0, %v4727_v2 }
  0x2a   :  { %4412 = vmatprep.subr.mxu0 %v4727_v2 }
  0x2b   :  { %v147_v26 = vsub.f32 %v145_v24, %v146_v25 }
  0x2c   :  { %4405 = vmatmul.mubr.f32.vlgmr.msra.gmra.mxu0 %v4775_v18 }
  0x2d   :  { %v148_v27 = vand.u32 4294901760, %v147_v26  ;;  %4413 = vmatpush3.msra.mxu0 %v146_v25  ;;  %4414 = vmatprep.mubr.msk.f32.mxu0 %vm4728_vm0, %v4727_v2 }
  0x2e   :  { %4422 = vmatprep.subr.mxu0 %v4727_v2 }
  0x2f   :  { %4398 = vmatpush3.msra.mxu1 %v148_v27 }
  0x30   :  { %4400 = vmatmul.mubr.f32.vlgmr.msra.gmra.mxu1 %v4772_v16  ;;  %4407 = vmatprep.subr.mxu1 %v4727_v2 }
  0x31   :  { %4408 = vmatpush3.msra.mxu1 %v68_v23  ;;  %4409 = vmatprep.mubr.msk.f32.mxu1 %vm4728_vm0, %v4727_v2 }
  0x32   :  { %4415 = vmatmul.mubr.f32.vlgmr.msra.gmra.mxu0 %v4772_v16  ;;  %4417 = vmatprep.subr.mxu1 %v4727_v2 }
  0x33   :  { %4424 = vmatprep.mubr.msk.f32.mxu0 %vm4728_vm0, %v4727_v2 }
  0x34   :  { %4410 = vmatmul.mubr.f32.vlgmr.msra.gmra.mxu1 %v4778_v19 }
  0x35   :  { %4418 = vmatpush3.msra.mxu1 %v68_v23  ;;  %4419 = vmatprep.mubr.msk.f32.mxu1 %vm4728_vm0, %v4727_v2 }
  0x36   :  { %4427 = vmatprep.subr.mxu1 %v4727_v2 }
  0x38   :  { %4420 = vmatmul.mubr.f32.vlgmr.msra.gmra.mxu1 %v4772_v16 }
  0x39   :  { %4429 = vmatprep.mubr.msk.f32.mxu1 %vm4728_vm0, %v4727_v2 }
  0xe8   :  { %v109_v28 = vpop.f32.mrf.mxu0 }
  0xea   :  { %v4396_v29 = vpop.f32.mrf.mxu0 }
  0xec   :  { %v259_v30 = vpop.f32.mrf.mxu0 }
  0xee   :  { %v4406_v31 = vpop.f32.mrf.mxu0 }
  0xef   :  { %v498_v31 = vld [vmem:[%s5111_s2 + $0x1] sm:$0x1] }
  0xf0   :  { %v185_v32 = vpop.f32.mrf.mxu1  ;;  %vm961_vm6 = vcmp.ne.f32.partialorder %v498_v31, 0.0 }
  0xf1   :  { %v186_v33 = vadd.f32 %v185_v32, %v109_v28  ;;  %v962_v32 = vsel %vm961_vm6, 1, %v4730_v48 }
  0xf2   :  { %v4401_v34 = vpop.f32.mrf.mxu1  ;;  %v407_v35 = vpop.f32.mrf.mxu0 }
  0xf3   :  { %v260_v36 = vadd.f32 %v259_v30, %v186_v33  ;;  %v4277_v33 = vld [vmem:[%s5110_s1 + $0x8] sm:$0xff]  ;;  %v966_v34 = vrot.slane %v962_v32, %v4812_v47 }
  0xf4   :  { %v333_v37 = vpop.f32.mrf.mxu1  ;;  %v4416_v38 = vpop.f32.mrf.mxu0 }
  0xf5   :  { %v334_v39 = vadd.f32 %v333_v37, %v260_v36  ;;  %vm967_vm7 = vcmp.eq.s32.totalorder %v966_v34, 1 }
  0xf6   :  { %v4411_v40 = vpop.f32.mrf.mxu1 }
  0xf7   :  { %v408_v41 = vadd.f32 %v407_v35, %v334_v39 }
  0xf8   :  { %v479_v42 = vpop.f32.mrf.mxu1 }
  0xf9   :  { %v480_v43 = vadd.f32 %v479_v42, %v408_v41 }
  0xfa   :  { %v4421_v44 = vpop.f32.mrf.mxu1 }
  0xfb   :  { %v484_v45 = vmax.f32 %v480_v43, 1e-30 }
  0xfd   :  { %4671 = vlog2.f32 %v484_v45 }
 0x10a   :  { %v4672_v53 = vpop.eup %4671 }
 0x10b   :  { %v486_v54 = vmul.f32 0.6931472, %v4672_v53 }
 0x10d   :  { %v487_v55 = vadd.f32 %v486_v54, %v483_v52 }
 0x10f   :  { %v4821_v56 = vsel %vm494_vm4, %v487_v55, %v4764_v6 }
 0x110   :  { %v500_v57 = vsel %vm499_vm5, %v4821_v56, -inf }
 0x111   :  { %v501_v58 = vrot.slane %v500_v57, 4 }
 0x113   :  { %v502_v59 = vmax.f32 %v500_v57, %v501_v58 }
 0x115   :  { %v503_v60 = vrot.slane %v502_v59, 2 }
 0x117   :  { %v504_v61 = vmax.f32 %v502_v59, %v503_v60 }
 0x119   :  { %v505_v62 = vrot.slane %v504_v61, 1 }
 0x11b   :  { %v506_v63 = vmax.f32 %v504_v61, %v505_v62 }
 0x11d   :  { %v507_v0 = vsub.f32 %v4821_v56, %v506_v63  ;;  %v956_v36 = vadd.f32 %v4277_v33, %v506_v63 }
 0x11f   :  { %v508_v1 = vmul.f32 1.442695, %v507_v0 }
 0x121   :  { %4673 = vpow2.f32 %v508_v1 }
 0x12e   :  { %v4674_v3 = vpop.eup %4673 }
 0x12f   :  { %v541_v4 = vand.u32 4294901760, %v4674_v3 }
 0x131   :  { %4423 = vmatpush3.msra.mxu0 %v541_v4  ;;  %v618_v5 = vsub.f32 %v4674_v3, %v541_v4 }
 0x132   :  { %4425 = vmatmul.mubr.f32.vlgmr.msra.gmra.mxu0 %v4782_v22  ;;  %4432 = vmatprep.subr.mxu0 %v4727_v2 }
 0x133   :  { %4433 = vmatpush3.msra.mxu0 %v618_v5  ;;  %4434 = vmatprep.mubr.msk.f32.mxu0 %vm4728_vm0, %v4727_v2  ;;  %v619_v6 = vand.u32 4294901760, %v618_v5 }
 0x134   :  { %4442 = vmatprep.subr.mxu0 %v4727_v2 }
 0x135   :  { %v620_v7 = vsub.f32 %v618_v5, %v619_v6 }
 0x136   :  { %4435 = vmatmul.mubr.f32.vlgmr.msra.gmra.mxu0 %v4775_v18 }
 0x137   :  { %4443 = vmatpush3.msra.mxu0 %v619_v6  ;;  %v621_v8 = vand.u32 4294901760, %v620_v7  ;;  %4444 = vmatprep.mubr.msk.f32.mxu0 %vm4728_vm0, %v4727_v2 }
 0x138   :  { %4452 = vmatprep.subr.mxu0 %v4727_v2 }
 0x139   :  { %4428 = vmatpush3.msra.mxu1 %v621_v8 }
 0x13a   :  { %4430 = vmatmul.mubr.f32.vlgmr.msra.gmra.mxu1 %v4772_v16  ;;  %4437 = vmatprep.subr.mxu1 %v4727_v2 }
 0x13b   :  { %4438 = vmatpush3.msra.mxu1 %v541_v4  ;;  %4439 = vmatprep.mubr.msk.f32.mxu1 %vm4728_vm0, %v4727_v2 }
 0x13c   :  { %4447 = vmatprep.subr.mxu1 %v4727_v2  ;;  %4445 = vmatmul.mubr.f32.vlgmr.msra.gmra.mxu0 %v4772_v16 }
 0x13d   :  { %4454 = vmatprep.mubr.msk.f32.mxu0 %vm4728_vm0, %v4727_v2 }
 0x13e   :  { %4440 = vmatmul.mubr.f32.vlgmr.msra.gmra.mxu1 %v4778_v19 }
 0x13f   :  { %4448 = vmatpush3.msra.mxu1 %v541_v4  ;;  %4449 = vmatprep.mubr.msk.f32.mxu1 %vm4728_vm0, %v4727_v2 }
 0x140   :  { %4457 = vmatprep.subr.mxu1 %v4727_v2 }
 0x142   :  { %4450 = vmatmul.mubr.f32.vlgmr.msra.gmra.mxu1 %v4772_v16 }
 0x143   :  { %4459 = vmatprep.mubr.msk.f32.mxu1 %vm4728_vm0, %v4727_v2 }
 0x1f2   :  { %v582_v9 = vpop.f32.mrf.mxu0 }
 0x1f4   :  { %v4426_v10 = vpop.f32.mrf.mxu0 }
 0x1f6   :  { %v732_v11 = vpop.f32.mrf.mxu0 }
 0x1f8   :  { %v4436_v12 = vpop.f32.mrf.mxu0 }
 0x1f9   :  { %v971_v12 = vld [vmem:[%s5111_s2 + $0x2] sm:$0x1] }
 0x1fa   :  { %v658_v13 = vpop.f32.mrf.mxu1  ;;  %vm1433_vm8 = vcmp.ne.f32.partialorder %v971_v12, 0.0 }
 0x1fb   :  { %v659_v14 = vadd.f32 %v658_v13, %v582_v9  ;;  %v1434_v13 = vsel %vm1433_vm8, 1, %v4730_v48 }
 0x1fc   :  { %v4431_v15 = vpop.f32.mrf.mxu1  ;;  %v880_v17 = vpop.f32.mrf.mxu0 }
 0x1fd   :  { %v733_v20 = vadd.f32 %v732_v11, %v659_v14  ;;  %v4278_v14 = vld [vmem:[%s5110_s1 + $0x10] sm:$0xff]  ;;  %v1438_v15 = vrot.slane %v1434_v13, %v4812_v47 }
 0x1fe   :  { %v806_v21 = vpop.f32.mrf.mxu1  ;;  %v4446_v23 = vpop.f32.mrf.mxu0 }
 0x1ff   :  { %v807_v24 = vadd.f32 %v806_v21, %v733_v20  ;;  %vm1439_vm9 = vcmp.eq.s32.totalorder %v1438_v15, 1 }
 0x200   :  { %v4441_v25 = vpop.f32.mrf.mxu1 }
 0x201   :  { %v881_v26 = vadd.f32 %v880_v17, %v807_v24 }
 0x202   :  { %v952_v27 = vpop.f32.mrf.mxu1 }
 0x203   :  { %v953_v28 = vadd.f32 %v952_v27, %v881_v26 }
 0x204   :  { %v4451_v29 = vpop.f32.mrf.mxu1 }
 0x205   :  { %v957_v30 = vmax.f32 %v953_v28, 1e-30 }
 0x207   :  { %4675 = vlog2.f32 %v957_v30 }
 0x214   :  { %v4676_v35 = vpop.eup %4675 }
 0x215   :  { %v959_v37 = vmul.f32 0.6931472, %v4676_v35 }
 0x217   :  { %v960_v38 = vadd.f32 %v959_v37, %v956_v36 }
 0x219   :  { %v4859_v39 = vsel %vm967_vm7, %v960_v38, %v4821_v56 }
 0x21a   :  { %v972_v40 = vsel %vm499_vm5, %v4859_v39, -inf }
 0x21b   :  { %v973_v41 = vrot.slane %v972_v40, 4 }
 0x21d   :  { %v974_v42 = vmax.f32 %v972_v40, %v973_v41 }
 0x21f   :  { %v975_v43 = vrot.slane %v974_v42, 2 }
 0x221   :  { %v976_v44 = vmax.f32 %v974_v42, %v975_v43 }
 0x223   :  { %v977_v45 = vrot.slane %v976_v44, 1 }
 0x225   :  { %v978_v46 = vmax.f32 %v976_v44, %v977_v45 }
 0x227   :  { %v979_v49 = vsub.f32 %v4859_v39, %v978_v46  ;;  %v1428_v20 = vadd.f32 %v4278_v14, %v978_v46 }
 0x229   :  { %v980_v50 = vmul.f32 1.442695, %v979_v49 }
 0x22b   :  { %4677 = vpow2.f32 %v980_v50 }
 0x238   :  { %v4678_v51 = vpop.eup %4677 }
 0x239   :  { %v1013_v52 = vand.u32 4294901760, %v4678_v51 }
 0x23b   :  { %4453 = vmatpush3.msra.mxu0 %v1013_v52  ;;  %v1090_v53 = vsub.f32 %v4678_v51, %v1013_v52 }
 0x23c   :  { %4455 = vmatmul.mubr.f32.vlgmr.msra.gmra.mxu0 %v4782_v22  ;;  %4462 = vmatprep.subr.mxu0 %v4727_v2 }
 0x23d   :  { %4463 = vmatpush3.msra.mxu0 %v1090_v53  ;;  %4464 = vmatprep.mubr.msk.f32.mxu0 %vm4728_vm0, %v4727_v2  ;;  %v1091_v54 = vand.u32 4294901760, %v1090_v53 }
 0x23e   :  { %4472 = vmatprep.subr.mxu0 %v4727_v2 }
 0x23f   :  { %v1092_v55 = vsub.f32 %v1090_v53, %v1091_v54 }
 0x240   :  { %4465 = vmatmul.mubr.f32.vlgmr.msra.gmra.mxu0 %v4775_v18 }
 0x241   :  { %4473 = vmatpush3.msra.mxu0 %v1091_v54  ;;  %v1093_v56 = vand.u32 4294901760, %v1092_v55  ;;  %4474 = vmatprep.mubr.msk.f32.mxu0 %vm4728_vm0, %v4727_v2 }
 0x242   :  { %4482 = vmatprep.subr.mxu0 %v4727_v2 }
 0x243   :  { %4458 = vmatpush3.msra.mxu1 %v1093_v56 }
 0x244   :  { %4460 = vmatmul.mubr.f32.vlgmr.msra.gmra.mxu1 %v4772_v16  ;;  %4467 = vmatprep.subr.mxu1 %v4727_v2 }
 0x245   :  { %4468 = vmatpush3.msra.mxu1 %v1013_v52  ;;  %4469 = vmatprep.mubr.msk.f32.mxu1 %vm4728_vm0, %v4727_v2 }
 0x246   :  { %4477 = vmatprep.subr.mxu1 %v4727_v2  ;;  %4475 = vmatmul.mubr.f32.vlgmr.msra.gmra.mxu0 %v4772_v16 }
 0x247   :  { %4484 = vmatprep.mubr.msk.f32.mxu0 %vm4728_vm0, %v4727_v2 }
 0x248   :  { %4470 = vmatmul.mubr.f32.vlgmr.msra.gmra.mxu1 %v4778_v19 }
 0x249   :  { %4478 = vmatpush3.msra.mxu1 %v1013_v52  ;;  %4479 = vmatprep.mubr.msk.f32.mxu1 %vm4728_vm0, %v4727_v2 }
 0x24a   :  { %4487 = vmatprep.subr.mxu1 %v4727_v2 }
 0x24c   :  { %4480 = vmatmul.mubr.f32.vlgmr.msra.gmra.mxu1 %v4772_v16 }
 0x24d   :  { %4489 = vmatprep.mubr.msk.f32.mxu1 %vm4728_vm0, %v4727_v2 }
 0x2fc   :  { %v1054_v57 = vpop.f32.mrf.mxu0 }
 0x2fe   :  { %v4456_v58 = vpop.f32.mrf.mxu0 }
 0x300   :  { %v1204_v59 = vpop.f32.mrf.mxu0 }
 0x302   :  { %v4466_v60 = vpop.f32.mrf.mxu0 }
 0x303   :  { %v1443_v60 = vld [vmem:[%s5111_s2 + $0x3] sm:$0x1] }
 0x304   :  { %v1130_v61 = vpop.f32.mrf.mxu1  ;;  %vm1905_vm10 = vcmp.ne.f32.partialorder %v1443_v60, 0.0 }
 0x305   :  { %v1131_v62 = vadd.f32 %v1130_v61, %v1054_v57  ;;  %v1906_v61 = vsel %vm1905_vm10, 1, %v4730_v48 }
 0x306   :  { %v4461_v63 = vpop.f32.mrf.mxu1  ;;  %v1352_v0 = vpop.f32.mrf.mxu0 }
 0x307   :  { %v1205_v1 = vadd.f32 %v1204_v59, %v1131_v62  ;;  %v4279_v62 = vld [vmem:[%s5110_s1 + $0x18] sm:$0xff]  ;;  %v1910_v63 = vrot.slane %v1906_v61, %v4812_v47 }
 0x308   :  { %v1278_v3 = vpop.f32.mrf.mxu1  ;;  %v4476_v4 = vpop.f32.mrf.mxu0 }
 0x309   :  { %v1279_v5 = vadd.f32 %v1278_v3, %v1205_v1  ;;  %vm1911_vm11 = vcmp.eq.s32.totalorder %v1910_v63, 1 }
 0x30a   :  { %v4471_v6 = vpop.f32.mrf.mxu1 }
 0x30b   :  { %v1353_v7 = vadd.f32 %v1352_v0, %v1279_v5 }
 0x30c   :  { %v1424_v8 = vpop.f32.mrf.mxu1 }
 0x30d   :  { %v1425_v9 = vadd.f32 %v1424_v8, %v1353_v7 }
 0x30e   :  { %v4481_v10 = vpop.f32.mrf.mxu1 }
 0x30f   :  { %v1429_v11 = vmax.f32 %v1425_v9, 1e-30 }
 0x311   :  { %4679 = vlog2.f32 %v1429_v11 }
 0x31e   :  { %v4680_v17 = vpop.eup %4679 }
 0x31f   :  { %v1431_v21 = vmul.f32 0.6931472, %v4680_v17 }
 0x321   :  { %v1432_v23 = vadd.f32 %v1431_v21, %v1428_v20 }
 0x323   :  { %v4897_v24 = vsel %vm1439_vm9, %v1432_v23, %v4859_v39 }
 0x324   :  { %v1444_v25 = vsel %vm499_vm5, %v4897_v24, -inf }
 0x325   :  { %v1445_v26 = vrot.slane %v1444_v25, 4 }
 0x327   :  { %v1446_v27 = vmax.f32 %v1444_v25, %v1445_v26 }
 0x329   :  { %v1447_v28 = vrot.slane %v1446_v27, 2 }
 0x32b   :  { %v1448_v29 = vmax.f32 %v1446_v27, %v1447_v28 }
 0x32d   :  { %v1449_v30 = vrot.slane %v1448_v29, 1 }
 0x32f   :  { %v1450_v31 = vmax.f32 %v1448_v29, %v1449_v30 }
 0x331   :  { %v1451_v32 = vsub.f32 %v4897_v24, %v1450_v31  ;;  %v1900_v1 = vadd.f32 %v4279_v62, %v1450_v31 }
 0x333   :  { %v1452_v33 = vmul.f32 1.442695, %v1451_v32 }
 0x335   :  { %4681 = vpow2.f32 %v1452_v33 }
 0x342   :  { %v4682_v34 = vpop.eup %4681 }
 0x343   :  { %v1485_v35 = vand.u32 4294901760, %v4682_v34 }
 0x345   :  { %4483 = vmatpush3.msra.mxu0 %v1485_v35  ;;  %v1562_v36 = vsub.f32 %v4682_v34, %v1485_v35 }
 0x346   :  { %4485 = vmatmul.mubr.f32.vlgmr.msra.gmra.mxu0 %v4782_v22  ;;  %4492 = vmatprep.subr.mxu0 %v4727_v2 }
 0x347   :  { %4493 = vmatpush3.msra.mxu0 %v1562_v36  ;;  %4494 = vmatprep.mubr.msk.f32.mxu0 %vm4728_vm0, %v4727_v2  ;;  %v1563_v37 = vand.u32 4294901760, %v1562_v36 }
 0x348   :  { %4502 = vmatprep.subr.mxu0 %v4727_v2 }
 0x349   :  { %v1564_v38 = vsub.f32 %v1562_v36, %v1563_v37 }
 0x34a   :  { %4495 = vmatmul.mubr.f32.vlgmr.msra.gmra.mxu0 %v4775_v18 }
 0x34b   :  { %4503 = vmatpush3.msra.mxu0 %v1563_v37  ;;  %v1565_v39 = vand.u32 4294901760, %v1564_v38  ;;  %4504 = vmatprep.mubr.msk.f32.mxu0 %vm4728_vm0, %v4727_v2 }
 0x34c   :  { %4512 = vmatprep.subr.mxu0 %v4727_v2 }
 0x34d   :  { %4488 = vmatpush3.msra.mxu1 %v1565_v39 }
 0x34e   :  { %4490 = vmatmul.mubr.f32.vlgmr.msra.gmra.mxu1 %v4772_v16  ;;  %4497 = vmatprep.subr.mxu1 %v4727_v2 }
 0x34f   :  { %4498 = vmatpush3.msra.mxu1 %v1485_v35  ;;  %4499 = vmatprep.mubr.msk.f32.mxu1 %vm4728_vm0, %v4727_v2 }
 0x350   :  { %4507 = vmatprep.subr.mxu1 %v4727_v2  ;;  %4505 = vmatmul.mubr.f32.vlgmr.msra.gmra.mxu0 %v4772_v16 }
 0x351   :  { %4514 = vmatprep.mubr.msk.f32.mxu0 %vm4728_vm0, %v4727_v2 }
 0x352   :  { %4500 = vmatmul.mubr.f32.vlgmr.msra.gmra.mxu1 %v4778_v19 }
 0x353   :  { %4508 = vmatpush3.msra.mxu1 %v1485_v35  ;;  %4509 = vmatprep.mubr.msk.f32.mxu1 %vm4728_vm0, %v4727_v2 }
 0x354   :  { %4517 = vmatprep.subr.mxu1 %v4727_v2 }
 0x356   :  { %4510 = vmatmul.mubr.f32.vlgmr.msra.gmra.mxu1 %v4772_v16 }
 0x357   :  { %4519 = vmatprep.mubr.msk.f32.mxu1 %vm4728_vm0, %v4727_v2 }
 0x406   :  { %v1526_v40 = vpop.f32.mrf.mxu0 }
 0x408   :  { %v4486_v41 = vpop.f32.mrf.mxu0 }
 0x40a   :  { %v1676_v42 = vpop.f32.mrf.mxu0 }
 0x40c   :  { %v4496_v43 = vpop.f32.mrf.mxu0 }
 0x40d   :  { %v1915_v43 = vld [vmem:[%s5111_s2 + $0x4] sm:$0x1] }
 0x40e   :  { %v1602_v44 = vpop.f32.mrf.mxu1  ;;  %vm2377_vm12 = vcmp.ne.f32.partialorder %v1915_v43, 0.0 }
 0x40f   :  { %v1603_v45 = vadd.f32 %v1602_v44, %v1526_v40  ;;  %v2378_v44 = vsel %vm2377_vm12, 1, %v4730_v48 }
 0x410   :  { %v4491_v46 = vpop.f32.mrf.mxu1  ;;  %v1824_v49 = vpop.f32.mrf.mxu0 }
 0x411   :  { %v1677_v50 = vadd.f32 %v1676_v42, %v1603_v45  ;;  %v4280_v45 = vld [vmem:[%s5110_s1 + $0x20] sm:$0xff]  ;;  %v2382_v46 = vrot.slane %v2378_v44, %v4812_v47 }
 0x412   :  { %v1750_v51 = vpop.f32.mrf.mxu1  ;;  %v4506_v52 = vpop.f32.mrf.mxu0 }
 0x413   :  { %v1751_v53 = vadd.f32 %v1750_v51, %v1677_v50  ;;  %vm2383_vm13 = vcmp.eq.s32.totalorder %v2382_v46, 1 }
 0x414   :  { %v4501_v54 = vpop.f32.mrf.mxu1 }
 0x415   :  { %v1825_v55 = vadd.f32 %v1824_v49, %v1751_v53 }
 0x416   :  { %v1896_v56 = vpop.f32.mrf.mxu1 }
 0x417   :  { %v1897_v57 = vadd.f32 %v1896_v56, %v1825_v55 }
 0x418   :  { %v4511_v58 = vpop.f32.mrf.mxu1 }
 0x419   :  { %v1901_v59 = vmax.f32 %v1897_v57, 1e-30 }
 0x41b   :  { %4683 = vlog2.f32 %v1901_v59 }
 0x428   :  { %v4684_v0 = vpop.eup %4683 }
 0x429   :  { %v1903_v3 = vmul.f32 0.6931472, %v4684_v0 }
 0x42b   :  { %v1904_v4 = vadd.f32 %v1903_v3, %v1900_v1 }
 0x42d   :  { %v4935_v5 = vsel %vm1911_vm11, %v1904_v4, %v4897_v24 }
 0x42e   :  { %v1916_v6 = vsel %vm499_vm5, %v4935_v5, -inf }
 0x42f   :  { %v1917_v7 = vrot.slane %v1916_v6, 4 }
 0x431   :  { %v1918_v8 = vmax.f32 %v1916_v6, %v1917_v7 }
 0x433   :  { %v1919_v9 = vrot.slane %v1918_v8, 2 }
 0x435   :  { %v1920_v10 = vmax.f32 %v1918_v8, %v1919_v9 }
 0x437   :  { %v1921_v11 = vrot.slane %v1920_v10, 1 }
 0x439   :  { %v1922_v12 = vmax.f32 %v1920_v10, %v1921_v11 }
 0x43b   :  { %v1923_v13 = vsub.f32 %v4935_v5, %v1922_v12  ;;  %v2372_v50 = vadd.f32 %v4280_v45, %v1922_v12 }
 0x43d   :  { %v1924_v14 = vmul.f32 1.442695, %v1923_v13 }
 0x43f   :  { %4685 = vpow2.f32 %v1924_v14 }
 0x44c   :  { %v4686_v15 = vpop.eup %4685 }
 0x44d   :  { %v1957_v17 = vand.u32 4294901760, %v4686_v15 }
 0x44f   :  { %4513 = vmatpush3.msra.mxu0 %v1957_v17  ;;  %v2034_v20 = vsub.f32 %v4686_v15, %v1957_v17 }
 0x450   :  { %4515 = vmatmul.mubr.f32.vlgmr.msra.gmra.mxu0 %v4782_v22  ;;  %4522 = vmatprep.subr.mxu0 %v4727_v2 }
 0x451   :  { %4523 = vmatpush3.msra.mxu0 %v2034_v20  ;;  %4524 = vmatprep.mubr.msk.f32.mxu0 %vm4728_vm0, %v4727_v2  ;;  %v2035_v21 = vand.u32 4294901760, %v2034_v20 }
 0x452   :  { %4532 = vmatprep.subr.mxu0 %v4727_v2 }
 0x453   :  { %v2036_v23 = vsub.f32 %v2034_v20, %v2035_v21 }
 0x454   :  { %4525 = vmatmul.mubr.f32.vlgmr.msra.gmra.mxu0 %v4775_v18 }
 0x455   :  { %4533 = vmatpush3.msra.mxu0 %v2035_v21  ;;  %v2037_v24 = vand.u32 4294901760, %v2036_v23  ;;  %4534 = vmatprep.mubr.msk.f32.mxu0 %vm4728_vm0, %v4727_v2 }
 0x456   :  { %4542 = vmatprep.subr.mxu0 %v4727_v2 }
 0x457   :  { %4518 = vmatpush3.msra.mxu1 %v2037_v24 }
 0x458   :  { %4520 = vmatmul.mubr.f32.vlgmr.msra.gmra.mxu1 %v4772_v16  ;;  %4527 = vmatprep.subr.mxu1 %v4727_v2 }
 0x459   :  { %4528 = vmatpush3.msra.mxu1 %v1957_v17  ;;  %4529 = vmatprep.mubr.msk.f32.mxu1 %vm4728_vm0, %v4727_v2 }
 0x45a   :  { %4537 = vmatprep.subr.mxu1 %v4727_v2  ;;  %4535 = vmatmul.mubr.f32.vlgmr.msra.gmra.mxu0 %v4772_v16 }
 0x45b   :  { %4544 = vmatprep.mubr.msk.f32.mxu0 %vm4728_vm0, %v4727_v2 }
 0x45c   :  { %4530 = vmatmul.mubr.f32.vlgmr.msra.gmra.mxu1 %v4778_v19 }
 0x45d   :  { %4538 = vmatpush3.msra.mxu1 %v1957_v17  ;;  %4539 = vmatprep.mubr.msk.f32.mxu1 %vm4728_vm0, %v4727_v2 }
 0x45e   :  { %4547 = vmatprep.subr.mxu1 %v4727_v2 }
 0x460   :  { %4540 = vmatmul.mubr.f32.vlgmr.msra.gmra.mxu1 %v4772_v16 }
 0x461   :  { %4549 = vmatprep.mubr.msk.f32.mxu1 %vm4728_vm0, %v4727_v2 }
 0x510   :  { %v1998_v25 = vpop.f32.mrf.mxu0 }
 0x512   :  { %v4516_v26 = vpop.f32.mrf.mxu0 }
 0x514   :  { %v2148_v27 = vpop.f32.mrf.mxu0 }
 0x516   :  { %v4526_v28 = vpop.f32.mrf.mxu0 }
 0x517   :  { %v2387_v28 = vld [vmem:[%s5111_s2 + $0x5] sm:$0x1] }
 0x518   :  { %v2074_v29 = vpop.f32.mrf.mxu1  ;;  %vm2849_vm14 = vcmp.ne.f32.partialorder %v2387_v28, 0.0 }
 0x519   :  { %v2075_v30 = vadd.f32 %v2074_v29, %v1998_v25  ;;  %v2850_v29 = vsel %vm2849_vm14, 1, %v4730_v48 }
 0x51a   :  { %v4521_v31 = vpop.f32.mrf.mxu1  ;;  %v2296_v32 = vpop.f32.mrf.mxu0 }
 0x51b   :  { %v2149_v33 = vadd.f32 %v2148_v27, %v2075_v30  ;;  %v4281_v30 = vld [vmem:[%s5110_s1 + $0x28] sm:$0xff]  ;;  %v2854_v31 = vrot.slane %v2850_v29, %v4812_v47 }
 0x51c   :  { %v2222_v34 = vpop.f32.mrf.mxu1  ;;  %v4536_v35 = vpop.f32.mrf.mxu0 }
 0x51d   :  { %v2223_v36 = vadd.f32 %v2222_v34, %v2149_v33  ;;  %vm2855_vm15 = vcmp.eq.s32.totalorder %v2854_v31, 1 }
 0x51e   :  { %v4531_v37 = vpop.f32.mrf.mxu1 }
 0x51f   :  { %v2297_v38 = vadd.f32 %v2296_v32, %v2223_v36 }
 0x520   :  { %v2368_v39 = vpop.f32.mrf.mxu1 }
 0x521   :  { %v2369_v40 = vadd.f32 %v2368_v39, %v2297_v38 }
 0x522   :  { %v4541_v41 = vpop.f32.mrf.mxu1 }
 0x523   :  { %v2373_v42 = vmax.f32 %v2369_v40, 1e-30 }
 0x525   :  { %4687 = vlog2.f32 %v2373_v42 }
 0x532   :  { %v4688_v49 = vpop.eup %4687 }
 0x533   :  { %v2375_v51 = vmul.f32 0.6931472, %v4688_v49 }
 0x535   :  { %v2376_v52 = vadd.f32 %v2375_v51, %v2372_v50 }
 0x537   :  { %v4973_v53 = vsel %vm2383_vm13, %v2376_v52, %v4935_v5 }
 0x538   :  { %v2388_v54 = vsel %vm499_vm5, %v4973_v53, -inf }
 0x539   :  { %v2389_v55 = vrot.slane %v2388_v54, 4 }
 0x53b   :  { %v2390_v56 = vmax.f32 %v2388_v54, %v2389_v55 }
 0x53d   :  { %v2391_v57 = vrot.slane %v2390_v56, 2 }
 0x53f   :  { %v2392_v58 = vmax.f32 %v2390_v56, %v2391_v57 }
 0x541   :  { %v2393_v59 = vrot.slane %v2392_v58, 1 }
 0x543   :  { %v2394_v60 = vmax.f32 %v2392_v58, %v2393_v59 }
 0x545   :  { %v2395_v61 = vsub.f32 %v4973_v53, %v2394_v60  ;;  %v2844_v33 = vadd.f32 %v4281_v30, %v2394_v60 }
 0x547   :  { %v2396_v62 = vmul.f32 1.442695, %v2395_v61 }
 0x549   :  { %4689 = vpow2.f32 %v2396_v62 }
 0x556   :  { %v4690_v63 = vpop.eup %4689 }
 0x557   :  { %v2429_v0 = vand.u32 4294901760, %v4690_v63 }
 0x559   :  { %4543 = vmatpush3.msra.mxu0 %v2429_v0  ;;  %v2506_v1 = vsub.f32 %v4690_v63, %v2429_v0 }
 0x55a   :  { %4545 = vmatmul.mubr.f32.vlgmr.msra.gmra.mxu0 %v4782_v22  ;;  %4552 = vmatprep.subr.mxu0 %v4727_v2 }
 0x55b   :  { %4553 = vmatpush3.msra.mxu0 %v2506_v1  ;;  %4554 = vmatprep.mubr.msk.f32.mxu0 %vm4728_vm0, %v4727_v2  ;;  %v2507_v3 = vand.u32 4294901760, %v2506_v1 }
 0x55c   :  { %4562 = vmatprep.subr.mxu0 %v4727_v2 }
 0x55d   :  { %v2508_v4 = vsub.f32 %v2506_v1, %v2507_v3 }
 0x55e   :  { %4555 = vmatmul.mubr.f32.vlgmr.msra.gmra.mxu0 %v4775_v18 }
 0x55f   :  { %4563 = vmatpush3.msra.mxu0 %v2507_v3  ;;  %v2509_v5 = vand.u32 4294901760, %v2508_v4  ;;  %4564 = vmatprep.mubr.msk.f32.mxu0 %vm4728_vm0, %v4727_v2 }
 0x560   :  { %4572 = vmatprep.subr.mxu0 %v4727_v2 }
 0x561   :  { %4548 = vmatpush3.msra.mxu1 %v2509_v5 }
 0x562   :  { %4550 = vmatmul.mubr.f32.vlgmr.msra.gmra.mxu1 %v4772_v16  ;;  %4557 = vmatprep.subr.mxu1 %v4727_v2 }
 0x563   :  { %4558 = vmatpush3.msra.mxu1 %v2429_v0  ;;  %4559 = vmatprep.mubr.msk.f32.mxu1 %vm4728_vm0, %v4727_v2 }
 0x564   :  { %4567 = vmatprep.subr.mxu1 %v4727_v2  ;;  %4565 = vmatmul.mubr.f32.vlgmr.msra.gmra.mxu0 %v4772_v16 }
 0x565   :  { %4574 = vmatprep.mubr.msk.f32.mxu0 %vm4728_vm0, %v4727_v2 }
 0x566   :  { %4560 = vmatmul.mubr.f32.vlgmr.msra.gmra.mxu1 %v4778_v19 }
 0x567   :  { %4568 = vmatpush3.msra.mxu1 %v2429_v0  ;;  %4569 = vmatprep.mubr.msk.f32.mxu1 %vm4728_vm0, %v4727_v2 }
 0x568   :  { %4577 = vmatprep.subr.mxu1 %v4727_v2 }
 0x56a   :  { %4570 = vmatmul.mubr.f32.vlgmr.msra.gmra.mxu1 %v4772_v16 }
 0x56b   :  { %4579 = vmatprep.mubr.msk.f32.mxu1 %vm4728_vm0, %v4727_v2 }
 0x61a   :  { %v2470_v6 = vpop.f32.mrf.mxu0 }
 0x61c   :  { %v4546_v7 = vpop.f32.mrf.mxu0 }
 0x61e   :  { %v2620_v8 = vpop.f32.mrf.mxu0 }
 0x620   :  { %v4556_v9 = vpop.f32.mrf.mxu0 }
 0x621   :  { %v2859_v9 = vld [vmem:[%s5111_s2 + $0x6] sm:$0x1] }
 0x622   :  { %v2546_v10 = vpop.f32.mrf.mxu1  ;;  %vm3321_vm1 = vcmp.ne.f32.partialorder %v2859_v9, 0.0 }
 0x623   :  { %v2547_v11 = vadd.f32 %v2546_v10, %v2470_v6  ;;  %v3322_v10 = vsel %vm3321_vm1, 1, %v4730_v48 }
 0x624   :  { %v4551_v12 = vpop.f32.mrf.mxu1  ;;  %v2768_v13 = vpop.f32.mrf.mxu0 }
 0x625   :  { %v2621_v14 = vadd.f32 %v2620_v8, %v2547_v11  ;;  %v4282_v11 = vld [vmem:[%s5110_s1 + $0x30] sm:$0xff]  ;;  %v3326_v12 = vrot.slane %v3322_v10, %v4812_v47 }
 0x626   :  { %v2694_v15 = vpop.f32.mrf.mxu1  ;;  %v4566_v17 = vpop.f32.mrf.mxu0 }
 0x627   :  { %v2695_v20 = vadd.f32 %v2694_v15, %v2621_v14  ;;  %vm3327_vm2 = vcmp.eq.s32.totalorder %v3326_v12, 1 }
 0x628   :  { %v4561_v21 = vpop.f32.mrf.mxu1 }
 0x629   :  { %v2769_v23 = vadd.f32 %v2768_v13, %v2695_v20 }
 0x62a   :  { %v2840_v24 = vpop.f32.mrf.mxu1 }
 0x62b   :  { %v2841_v25 = vadd.f32 %v2840_v24, %v2769_v23 }
 0x62c   :  { %v4571_v26 = vpop.f32.mrf.mxu1 }
 0x62d   :  { %v2845_v27 = vmax.f32 %v2841_v25, 1e-30 }
 0x62f   :  { %4691 = vlog2.f32 %v2845_v27 }
 0x63c   :  { %v4692_v32 = vpop.eup %4691 }
 0x63d   :  { %v2847_v34 = vmul.f32 0.6931472, %v4692_v32 }
 0x63f   :  { %v2848_v35 = vadd.f32 %v2847_v34, %v2844_v33 }
 0x641   :  { %v5011_v36 = vsel %vm2855_vm15, %v2848_v35, %v4973_v53 }
 0x642   :  { %v2860_v37 = vsel %vm499_vm5, %v5011_v36, -inf }
 0x643   :  { %v2861_v38 = vrot.slane %v2860_v37, 4 }
 0x645   :  { %v2862_v39 = vmax.f32 %v2860_v37, %v2861_v38 }
 0x647   :  { %v2863_v40 = vrot.slane %v2862_v39, 2 }
 0x649   :  { %v2864_v41 = vmax.f32 %v2862_v39, %v2863_v40 }
 0x64b   :  { %v2865_v42 = vrot.slane %v2864_v41, 1 }
 0x64d   :  { %v2866_v43 = vmax.f32 %v2864_v41, %v2865_v42 }
 0x64f   :  { %v2867_v44 = vsub.f32 %v5011_v36, %v2866_v43  ;;  %v3316_v14 = vadd.f32 %v4282_v11, %v2866_v43 }
 0x651   :  { %v2868_v45 = vmul.f32 1.442695, %v2867_v44 }
 0x653   :  { %4693 = vpow2.f32 %v2868_v45 }
 0x660   :  { %v4694_v46 = vpop.eup %4693 }
 0x661   :  { %v2901_v49 = vand.u32 4294901760, %v4694_v46 }
 0x663   :  { %4573 = vmatpush3.msra.mxu0 %v2901_v49  ;;  %v2978_v50 = vsub.f32 %v4694_v46, %v2901_v49 }
 0x664   :  { %4575 = vmatmul.mubr.f32.vlgmr.msra.gmra.mxu0 %v4782_v22  ;;  %4582 = vmatprep.subr.mxu0 %v4727_v2 }
 0x665   :  { %4583 = vmatpush3.msra.mxu0 %v2978_v50  ;;  %4584 = vmatprep.mubr.msk.f32.mxu0 %vm4728_vm0, %v4727_v2  ;;  %v2979_v51 = vand.u32 4294901760, %v2978_v50 }
 0x666   :  { %4592 = vmatprep.subr.mxu0 %v4727_v2 }
 0x667   :  { %v2980_v52 = vsub.f32 %v2978_v50, %v2979_v51 }
 0x668   :  { %4585 = vmatmul.mubr.f32.vlgmr.msra.gmra.mxu0 %v4775_v18 }
 0x669   :  { %4593 = vmatpush3.msra.mxu0 %v2979_v51  ;;  %v2981_v53 = vand.u32 4294901760, %v2980_v52  ;;  %4594 = vmatprep.mubr.msk.f32.mxu0 %vm4728_vm0, %v4727_v2 }
 0x66a   :  { %4602 = vmatprep.subr.mxu0 %v4727_v2 }
 0x66b   :  { %4578 = vmatpush3.msra.mxu1 %v2981_v53 }
 0x66c   :  { %4580 = vmatmul.mubr.f32.vlgmr.msra.gmra.mxu1 %v4772_v16  ;;  %4587 = vmatprep.subr.mxu1 %v4727_v2 }
 0x66d   :  { %4588 = vmatpush3.msra.mxu1 %v2901_v49  ;;  %4589 = vmatprep.mubr.msk.f32.mxu1 %vm4728_vm0, %v4727_v2 }
 0x66e   :  { %4597 = vmatprep.subr.mxu1 %v4727_v2  ;;  %4595 = vmatmul.mubr.f32.vlgmr.msra.gmra.mxu0 %v4772_v16 }
 0x66f   :  { %4604 = vmatprep.mubr.msk.f32.mxu0 %vm4728_vm0, %v4727_v2 }
 0x670   :  { %4590 = vmatmul.mubr.f32.vlgmr.msra.gmra.mxu1 %v4778_v19 }
 0x671   :  { %4598 = vmatpush3.msra.mxu1 %v2901_v49  ;;  %4599 = vmatprep.mubr.msk.f32.mxu1 %vm4728_vm0, %v4727_v2 }
 0x672   :  { %4607 = vmatprep.subr.mxu1 %v4727_v2 }
 0x674   :  { %4600 = vmatmul.mubr.f32.vlgmr.msra.gmra.mxu1 %v4772_v16 }
 0x675   :  { %4609 = vmatprep.mubr.msk.f32.mxu1 %vm4728_vm0, %v4727_v2 }
 0x724   :  { %v2942_v54 = vpop.f32.mrf.mxu0 }
 0x726   :  { %v4576_v55 = vpop.f32.mrf.mxu0 }
 0x728   :  { %v3092_v56 = vpop.f32.mrf.mxu0 }
 0x72a   :  { %v4586_v57 = vpop.f32.mrf.mxu0 }
 0x72b   :  { %v3331_v57 = vld [vmem:[%s5111_s2 + $0x7] sm:$0x1] }
 0x72c   :  { %v3018_v58 = vpop.f32.mrf.mxu1  ;;  %vm3793_vm3 = vcmp.ne.f32.partialorder %v3331_v57, 0.0 }
 0x72d   :  { %v3019_v59 = vadd.f32 %v3018_v58, %v2942_v54  ;;  %v3794_v58 = vsel %vm3793_vm3, 1, %v4730_v48 }
 0x72e   :  { %v4581_v60 = vpop.f32.mrf.mxu1  ;;  %v3240_v61 = vpop.f32.mrf.mxu0 }
 0x72f   :  { %v3093_v62 = vadd.f32 %v3092_v56, %v3019_v59  ;;  %v4283_v59 = vld [vmem:[%s5110_s1 + $0x38] sm:$0xff]  ;;  %v3798_v60 = vrot.slane %v3794_v58, %v4812_v47  ;;  %s4731_s1 = smov [#allocation2]  }
 0x730   :  { %v3166_v63 = vpop.f32.mrf.mxu1  ;;  %v4596_v0 = vpop.f32.mrf.mxu0  ;;  %s4269_s2 = sshll.u32 %s4731_s1, 4  ;;  %s4270_s2 = int_to_ptr.vmem [resolvable:$true] %s4269_s2 }
 0x731   :  { %v3167_v1 = vadd.f32 %v3166_v63, %v3093_v62  ;;  %vm3799_vm4 = vcmp.eq.s32.totalorder %v3798_v60, 1  ;;  %s4705_s17 = scalar_lea.vmem %s4270_s2, 16  ;;  %s4709_s18 = scalar_lea.vmem %s4270_s2, 32 }
 0x732   :  { %v4591_v3 = vpop.f32.mrf.mxu1  ;;  %p4706_p0 = scmp.ne.s32.totalorder %s4270_s2, %s4705_s17  ;;  %p4710_p1 = scmp.lt.s32.totalorder %s4270_s2, %s4270_s2 }
 0x733   :  { %v3241_v4 = vadd.f32 %v3240_v61, %v3167_v1  ;;  %p4711_p2 = scmp.lt.s32.totalorder %s4709_s18, %s4705_s17 }
 0x734   :  { %v3312_v5 = vpop.f32.mrf.mxu1 }
 0x735   :  { %v3313_v6 = vadd.f32 %v3312_v5, %v3241_v4  ;;  %p4712_p3 = por %p4711_p2, %p4710_p1 }
 0x736   :  { %v4601_v7 = vpop.f32.mrf.mxu1 }
 0x737   :  { %v3317_v8 = vmax.f32 %v3313_v6, 1e-30  ;;  %p4713_p4 = pnand %p4712_p3, %p4706_p0 }
 0x739   :  { %4695 = vlog2.f32 %v3317_v8 }
 0x746   :  { %v4696_v13 = vpop.eup %4695 }
 0x747   :  { %v3319_v15 = vmul.f32 0.6931472, %v4696_v13 }
 0x749   :  { %v3320_v17 = vadd.f32 %v3319_v15, %v3316_v14 }
 0x74b   :  { %v5049_v20 = vsel %vm3327_vm2, %v3320_v17, %v5011_v36 }
 0x74c   :  { %v3332_v21 = vsel %vm499_vm5, %v5049_v20, -inf }
 0x74d   :  { %v3333_v23 = vrot.slane %v3332_v21, 4 }
 0x74f   :  { %v3334_v24 = vmax.f32 %v3332_v21, %v3333_v23 }
 0x751   :  { %v3335_v25 = vrot.slane %v3334_v24, 2 }
 0x753   :  { %v3336_v26 = vmax.f32 %v3334_v24, %v3335_v25 }
 0x755   :  { %v3337_v27 = vrot.slane %v3336_v26, 1 }
 0x757   :  { %v3338_v28 = vmax.f32 %v3336_v26, %v3337_v27 }
 0x759   :  { %v3339_v29 = vsub.f32 %v5049_v20, %v3338_v28  ;;  %v3788_v62 = vadd.f32 %v4283_v59, %v3338_v28 }
 0x75b   :  { %v3340_v30 = vmul.f32 1.442695, %v3339_v29 }
 0x75d   :  { %4697 = vpow2.f32 %v3340_v30 }
 0x76a   :  { %v4698_v31 = vpop.eup %4697 }
 0x76b   :  { %v3373_v32 = vand.u32 4294901760, %v4698_v31 }
 0x76d   :  { %4603 = vmatpush3.msra.mxu0 %v3373_v32  ;;  %v3450_v33 = vsub.f32 %v4698_v31, %v3373_v32 }
 0x76e   :  { %4605 = vmatmul.mubr.f32.vlgmr.msra.gmra.mxu0 %v4782_v22  ;;  %4612 = vmatprep.subr.mxu0 %v4727_v2 }
 0x76f   :  { %4613 = vmatpush3.msra.mxu0 %v3450_v33  ;;  %4614 = vmatprep.mubr.msk.f32.mxu0 %vm4728_vm0, %v4727_v2  ;;  %v3451_v34 = vand.u32 4294901760, %v3450_v33 }
 0x770   :  { %4622 = vmatprep.subr.mxu0 %v4727_v2 }
 0x771   :  { %v3452_v35 = vsub.f32 %v3450_v33, %v3451_v34 }
 0x772   :  { %4615 = vmatmul.mubr.f32.vlgmr.msra.gmra.mxu0 %v4775_v18 }
 0x773   :  { %4623 = vmatpush3.msra.mxu0 %v3451_v34  ;;  %v3453_v36 = vand.u32 4294901760, %v3452_v35  ;;  %4624 = vmatprep.mubr.msk.f32.mxu0 %vm4728_vm0, %v4727_v2 }
 0x774   :  { %4632 = vmatprep.subr.mxu0 %v4727_v2 }
 0x775   :  { %4608 = vmatpush3.msra.mxu1 %v3453_v36 }
 0x776   :  { %4610 = vmatmul.mubr.f32.vlgmr.msra.gmra.mxu1 %v4772_v16  ;;  %4617 = vmatprep.subr.mxu1 %v4727_v2 }
 0x777   :  { %4618 = vmatpush3.msra.mxu1 %v3373_v32  ;;  %4619 = vmatprep.mubr.msk.f32.mxu1 %vm4728_vm0, %v4727_v2 }
 0x778   :  { %4627 = vmatprep.subr.mxu1 %v4727_v2  ;;  %4625 = vmatmul.mubr.f32.vlgmr.msra.gmra.mxu0 %v4772_v16 }
 0x779   :  { %4634 = vmatprep.mubr.msk.f32.mxu0 %vm4728_vm0, %v4727_v2 }
 0x77a   :  { %4620 = vmatmul.mubr.f32.vlgmr.msra.gmra.mxu1 %v4778_v19 }
 0x77b   :  { %4628 = vmatpush3.msra.mxu1 %v3373_v32  ;;  %4629 = vmatprep.mubr.msk.f32.mxu1 %vm4728_vm0, %v4727_v2 }
 0x77c   :  { %4637 = vmatprep.subr.mxu1 %v4727_v2 }
 0x77e   :  { %4630 = vmatmul.mubr.f32.vlgmr.msra.gmra.mxu1 %v4772_v16 }
 0x77f   :  { %4639 = vmatprep.mubr.msk.f32.mxu1 %vm4728_vm0, %v4727_v2 }
 0x82e   :  { %v3414_v37 = vpop.f32.mrf.mxu0 }
 0x830   :  { %v4606_v38 = vpop.f32.mrf.mxu0 }
 0x832   :  { %v3564_v39 = vpop.f32.mrf.mxu0 }
 0x834   :  { %v4616_v40 = vpop.f32.mrf.mxu0 }
 0x836   :  { %v3490_v41 = vpop.f32.mrf.mxu1 }
 0x837   :  { %v3491_v42 = vadd.f32 %v3490_v41, %v3414_v37 }
 0x838   :  { %v4611_v43 = vpop.f32.mrf.mxu1  ;;  %v3712_v44 = vpop.f32.mrf.mxu0 }
 0x839   :  { %v3565_v45 = vadd.f32 %v3564_v39, %v3491_v42 }
 0x83a   :  { %v3638_v46 = vpop.f32.mrf.mxu1  ;;  %v4626_v49 = vpop.f32.mrf.mxu0 }
 0x83b   :  { %v3639_v50 = vadd.f32 %v3638_v46, %v3565_v45 }
 0x83c   :  { %v4621_v51 = vpop.f32.mrf.mxu1 }
 0x83d   :  { %v3713_v52 = vadd.f32 %v3712_v44, %v3639_v50 }
 0x83e   :  { %v3784_v53 = vpop.f32.mrf.mxu1 }
 0x83f   :  { %v3785_v54 = vadd.f32 %v3784_v53, %v3713_v52 }
 0x840   :  { %v4631_v55 = vpop.f32.mrf.mxu1 }
 0x841   :  { %v3789_v56 = vmax.f32 %v3785_v54, 1e-30 }
 0x843   :  { %4699 = vlog2.f32 %v3789_v56 }
 0x850   :  { %v4700_v61 = vpop.eup %4699 }
 0x851   :  { %v3791_v63 = vmul.f32 0.6931472, %v4700_v61 }
 0x853   :  { %v3792_v0 = vadd.f32 %v3791_v63, %v3788_v62 }
 0x855   :  { %v3800_v1 = vsel %vm3799_vm4, %v3792_v0, %v5049_v20 }
 0x856   :  { %v3801_v3 = vsel %vm499_vm5, %v3800_v1, -inf }
 0x857   :  { %v3802_v4 = vrot.slane %v3801_v3, 4 }
 0x859   :  { %v3803_v5 = vmax.f32 %v3801_v3, %v3802_v4 }
 0x85b   :  { %v3804_v6 = vrot.slane %v3803_v5, 2 }
 0x85d   :  { %v3805_v7 = vmax.f32 %v3803_v5, %v3804_v6 }
 0x85f   :  { %v3806_v48 = vrot.slane %v3805_v7, 1 }
 0x861   :  { %v3807_v8 = vmax.f32 %v3805_v7, %v3806_v48 }
 0x863   :  { %v3808_v9 = vsub.f32 %v3800_v1, %v3807_v8 }
 0x865   :  { %v3809_v10 = vmul.f32 1.442695, %v3808_v9 }
 0x867   :  { %4701 = vpow2.f32 %v3809_v10 }
 0x874   :  { %v4702_v11 = vpop.eup %4701 }
 0x875   :  { %v3842_v47 = vand.u32 4294901760, %v4702_v11 }
 0x877   :  { %4633 = vmatpush3.msra.mxu0 %v3842_v47  ;;  %v3919_v12 = vsub.f32 %v4702_v11, %v3842_v47 }
 0x878   :  { %4635 = vmatmul.mubr.f32.vlgmr.msra.gmra.mxu0 %v4782_v22  ;;  %4642 = vmatprep.subr.mxu0 %v4727_v2 }
 0x879   :  { %4643 = vmatpush3.msra.mxu0 %v3919_v12  ;;  %4644 = vmatprep.mubr.msk.f32.mxu0 %vm4728_vm0, %v4727_v2  ;;  %v3920_v13 = vand.u32 4294901760, %v3919_v12 }
 0x87a   :  { %4652 = vmatprep.subr.mxu0 %v4727_v2 }
 0x87b   :  { %v3921_v14 = vsub.f32 %v3919_v12, %v3920_v13 }
 0x87c   :  { %4645 = vmatmul.mubr.f32.vlgmr.msra.gmra.mxu0 %v4775_v18 }
 0x87d   :  { %4653 = vmatpush3.msra.mxu0 %v3920_v13  ;;  %v3922_v15 = vand.u32 4294901760, %v3921_v14  ;;  %4654 = vmatprep.mubr.msk.f32.mxu0 %vm4728_vm0, %v4727_v2 }
 0x87f   :  { %4638 = vmatpush3.msra.mxu1 %v3922_v15 }
 0x880   :  { %4640 = vmatmul.mubr.f32.vlgmr.msra.gmra.mxu1 %v4772_v16  ;;  %4647 = vmatprep.subr.mxu1 %v4727_v2 }
 0x881   :  { %4648 = vmatpush3.msra.mxu1 %v3842_v47  ;;  %4649 = vmatprep.mubr.msk.f32.mxu1 %vm4728_vm0, %v4727_v2 }
 0x882   :  { %4657 = vmatprep.subr.mxu1 %v4727_v2  ;;  %4655 = vmatmul.mubr.f32.vlgmr.msra.gmra.mxu0 %v4772_v16 }
 0x884   :  { %4650 = vmatmul.mubr.f32.vlgmr.msra.gmra.mxu1 %v4778_v19 }
 0x885   :  { %4658 = vmatpush3.msra.mxu1 %v3842_v47  ;;  %4659 = vmatprep.mubr.msk.f32.mxu1 %vm4728_vm0, %v4727_v2  ;;  %vm4261_vm0 = vcmask 31751  }
 0x888   :  { %4660 = vmatmul.mubr.f32.vlgmr.msra.gmra.mxu1 %v4772_v16 }
 0x938   :  { %v3883_v18 = vpop.f32.mrf.mxu0 }
 0x93a   :  { %v4636_v22 = vpop.f32.mrf.mxu0 }
 0x93c   :  { %v4033_v17 = vpop.f32.mrf.mxu0 }
 0x93e   :  { %v4646_v20 = vpop.f32.mrf.mxu0 }
 0x940   :  { %v3959_v21 = vpop.f32.mrf.mxu1 }
 0x941   :  { %v3960_v23 = vadd.f32 %v3959_v21, %v3883_v18 }
 0x942   :  { %v4641_v24 = vpop.f32.mrf.mxu1  ;;  %v4181_v25 = vpop.f32.mrf.mxu0 }
 0x943   :  { %v4034_v26 = vadd.f32 %v4033_v17, %v3960_v23 }
 0x944   :  { %v4107_v27 = vpop.f32.mrf.mxu1  ;;  %v4656_v28 = vpop.f32.mrf.mxu0 }
 0x945   :  { %v4108_v29 = vadd.f32 %v4107_v27, %v4034_v26 }
 0x946   :  { %v4651_v30 = vpop.f32.mrf.mxu1 }
 0x947   :  { %v4182_v19 = vadd.f32 %v4181_v25, %v4108_v29 }
 0x948   :  { %v4253_v31 = vpop.f32.mrf.mxu1 }
 0x949   :  { %v4254_v32 = vadd.f32 %v4253_v31, %v4182_v19 }
 0x94a   :  { %v4661_v33 = vpop.f32.mrf.mxu1 }
 0x94b   :  { %v4257_v2 = vmax.f32 %v4254_v32, 1e-30 }
 0x94d   :  { %4703 = vlog2.f32 %v4257_v2 }
 0x95a   :  { %v4704_v16 = vpop.eup %4703 }
 0x95b   :  { %v4259_v34 = vmul.f32 0.6931472, %v4704_v16 }
 0x95d   :  { %v4260_v35 = vadd.f32 %v4259_v34, %v3807_v8 }
 0x95f   :  { %4262 = vst.msk [vmem:[#allocation2 - $0x7] sm:$0x80] %vm4261_vm0, %v4260_v35 }
 0x960   :  { %4716 = shalt.err (!%p4713_p4)
}
 0x961   :  { %4272 = dma.vmem_to_hbm [thread:$0]  %s4270_s2, 16, %s5112_s3, [#allocation3]  }
 0x962   :  { %4725 = dma.done.wait [#allocation3], 16  }
 0x963   :  { %4726 = vsyncadd [#allocation3], 4294967280 }
 0x964   :  { %4276 = vsyncpa [#allocation3], 1 }

</bundles_post_ra>
